<compile_context>
chip_gen: v7x
topology: tpu7x:2x2x1
jax: 0.10.0
libtpu: 0.0.40
codegen_flags: <defaults>
</compile_context>

<pallas_src>
import functools

import jax
import jax.numpy as jnp
from jax.experimental import pallas as pl
from jax.experimental.pallas import tpu as pltpu


def _round_up(n, m):
    return ((n + m - 1) // m) * m


@functools.partial(jax.jit, static_argnames=("dropout_p",))
def mlp_forward(x, params, key, dropout_p):
    """Forward pass of the 6-layer dropout MLP.

    x:      (batch, input_size) f32
    params: list of (weight (out, in), bias (out,)) tuples in PyTorch layout.
    key:    jax PRNG key used for the 6 dropout masks.
    """
    B, input_size = x.shape
    n_layers = len(params)
    out_size = params[-1][0].shape[0]
    out_pad = _round_up(out_size, 128)

    # Batch tiling: 128-row tiles (good MXU M-fill on v5e, fine on v6e/v7x),
    # falling back to a single sublane-aligned tile for tiny batches.
    tile_b = 128 if B >= 128 else _round_up(B, 8)
    b_pad = _round_up(B, tile_b)
    grid = (b_pad // tile_b,)

    x_pad = x.astype(jnp.float32)
    if b_pad != B:
        x_pad = jnp.pad(x_pad, ((0, b_pad - B), (0, 0)))

    # Pre-scaled dropout masks: values in {0, 1/(1-p)} -> in-kernel dropout is
    # one VPU multiply per element.  One mask per layer input.
    in_feats = [w.shape[1] for (w, _) in params]
    keep_p = 1.0 - dropout_p
    scale = (1.0 / keep_p) if dropout_p > 0.0 else 1.0
    mask_keys = jax.random.split(key, n_layers)
    masks = [
        jax.random.bernoulli(mask_keys[i], keep_p, (b_pad, f)).astype(jnp.float32)
        * jnp.float32(scale)
        for i, f in enumerate(in_feats)
    ]

    # Weights -> (in, out) bf16, biases -> (1, out) f32; the last layer is
    # zero-padded on its output dim so the final store is lane-dense.
    flat = []
    for li, (w, b) in enumerate(params):
        wt = jnp.asarray(w, jnp.float32).T           # (in, out)
        bv = jnp.asarray(b, jnp.float32)[None, :]    # (1, out)
        if li == n_layers - 1 and out_pad != out_size:
            wt = jnp.pad(wt, ((0, 0), (0, out_pad - out_size)))
            bv = jnp.pad(bv, ((0, 0), (0, out_pad - out_size)))
        flat.append(wt.astype(jnp.bfloat16))
        flat.append(bv)

    def kernel(*refs):
        x_ref = refs[0]
        mask_refs = refs[1:1 + n_layers]
        wb_refs = refs[1 + n_layers:1 + 3 * n_layers]
        o_ref = refs[-1]

        h = x_ref[...]                               # (tile_b, input_size) f32
        for li in range(n_layers):
            w_ref = wb_refs[2 * li]
            b_ref = wb_refs[2 * li + 1]
            # dropout = one multiply by the pre-scaled {0, 1/(1-p)} mask,
            # then bf16 operands into the MXU with f32 accumulation.
            hm = (h * mask_refs[li][...]).astype(jnp.bfloat16)
            y = jnp.dot(hm, w_ref[...], preferred_element_type=jnp.float32)
            y = y + b_ref[...]
            h = jnp.maximum(y, 0.0) if li < n_layers - 1 else y
        o_ref[...] = h.astype(o_ref.dtype)

    def batch_spec(feat):
        return pl.BlockSpec((tile_b, feat), lambda i: (i, 0))

    def resident_spec(a):
        # Full-array block, constant block index -> stays VMEM-resident.
        return pl.BlockSpec(a.shape, lambda i: (0, 0))

    in_specs = [batch_spec(input_size)]
    in_specs += [batch_spec(f) for f in in_feats]
    in_specs += [resident_spec(a) for a in flat]

    y_pad = pl.pallas_call(
        kernel,
        out_shape=jax.ShapeDtypeStruct((b_pad, out_pad), jnp.float32),
        grid=grid,
        in_specs=in_specs,
        out_specs=pl.BlockSpec((tile_b, out_pad), lambda i: (i, 0)),
        compiler_params=pltpu.CompilerParams(
            dimension_semantics=("parallel",)),
    )(x_pad, *masks, *flat)

    return y_pad[:B, :out_size]


if __name__ == "__main__":
    # Shapes consistent with the module's __init__:
    # input_size, hidden_size1, hidden_size2, z_size, output_size, dropout_p
    input_size, hidden1, hidden2, z_size, output_size = 32, 64, 48, 16, 10
    dropout_p = 0.2
    batch = 256   # multiple of the 128-row batch tile -> 2 parallel grid steps

    key = jax.random.PRNGKey(0)

    # Deterministic parameter init mimicking nn.Linear's U(-1/sqrt(in), 1/sqrt(in))
    layer_dims = [(input_size, hidden1),   # h1
                  (hidden1, hidden2),      # h2
                  (hidden2, z_size),       # z
                  (z_size, hidden2),       # h4
                  (hidden2, hidden1),      # h5
                  (hidden1, output_size)]  # h6
    params = []
    for fin, fout in layer_dims:
        key, kw, kb = jax.random.split(key, 3)
        bound = 1.0 / (fin ** 0.5)
        w = jax.random.uniform(kw, (fout, fin), jnp.float32, -bound, bound)  # PyTorch (out, in)
        b = jax.random.uniform(kb, (fout,), jnp.float32, -bound, bound)
        params.append((w, b))

    key, kx, kdrop = jax.random.split(key, 3)
    x = jax.random.uniform(kx, (batch, input_size), jnp.float32)

    y = mlp_forward(x, params, kdrop, dropout_p)
    jax.block_until_ready(y)
    assert y.shape == (batch, output_size), y.shape
    assert bool(jnp.all(jnp.isfinite(y)))
    print("KERNEL_OK")
</pallas_src>

<mosaic_0001>
module attributes {stable_mosaic.version = 11 : i64} {
  func.func @kernel(%arg0: i32, %arg1: memref<128x32xf32, #tpu.memory_space<vmem>>, %arg2: memref<128x32xf32, #tpu.memory_space<vmem>>, %arg3: memref<128x64xf32, #tpu.memory_space<vmem>>, %arg4: memref<128x48xf32, #tpu.memory_space<vmem>>, %arg5: memref<128x16xf32, #tpu.memory_space<vmem>>, %arg6: memref<128x48xf32, #tpu.memory_space<vmem>>, %arg7: memref<128x64xf32, #tpu.memory_space<vmem>>, %arg8: memref<32x64xbf16, #tpu.memory_space<vmem>>, %arg9: memref<1x64xf32, #tpu.memory_space<vmem>>, %arg10: memref<64x48xbf16, #tpu.memory_space<vmem>>, %arg11: memref<1x48xf32, #tpu.memory_space<vmem>>, %arg12: memref<48x16xbf16, #tpu.memory_space<vmem>>, %arg13: memref<1x16xf32, #tpu.memory_space<vmem>>, %arg14: memref<16x48xbf16, #tpu.memory_space<vmem>>, %arg15: memref<1x48xf32, #tpu.memory_space<vmem>>, %arg16: memref<48x64xbf16, #tpu.memory_space<vmem>>, %arg17: memref<1x64xf32, #tpu.memory_space<vmem>>, %arg18: memref<64x128xbf16, #tpu.memory_space<vmem>>, %arg19: memref<1x128xf32, #tpu.memory_space<vmem>>, %arg20: memref<128x128xf32, #tpu.memory_space<vmem>>) attributes {dimension_semantics = [#tpu.dimension_semantics<parallel>], iteration_bounds = array<i64: 2>, scalar_prefetch = 0 : i64, scratch_operands = 0 : i64, tpu.core_type = #tpu.core_type<tc>, window_params = [{transform_indices = @transform_0, window_bounds = array<i64: 128, 32>}, {transform_indices = @transform_1, window_bounds = array<i64: 128, 32>}, {transform_indices = @transform_2, window_bounds = array<i64: 128, 64>}, {transform_indices = @transform_3, window_bounds = array<i64: 128, 48>}, {transform_indices = @transform_4, window_bounds = array<i64: 128, 16>}, {transform_indices = @transform_5, window_bounds = array<i64: 128, 48>}, {transform_indices = @transform_6, window_bounds = array<i64: 128, 64>}, {pipeline_mode = #tpu.pipeline_mode<synchronous>, transform_indices = @transform_7, window_bounds = array<i64: 32, 64>}, {pipeline_mode = #tpu.pipeline_mode<synchronous>, transform_indices = @transform_8, window_bounds = array<i64: 1, 64>}, {pipeline_mode = #tpu.pipeline_mode<synchronous>, transform_indices = @transform_9, window_bounds = array<i64: 64, 48>}, {pipeline_mode = #tpu.pipeline_mode<synchronous>, transform_indices = @transform_10, window_bounds = array<i64: 1, 48>}, {pipeline_mode = #tpu.pipeline_mode<synchronous>, transform_indices = @transform_11, window_bounds = array<i64: 48, 16>}, {pipeline_mode = #tpu.pipeline_mode<synchronous>, transform_indices = @transform_12, window_bounds = array<i64: 1, 16>}, {pipeline_mode = #tpu.pipeline_mode<synchronous>, transform_indices = @transform_13, window_bounds = array<i64: 16, 48>}, {pipeline_mode = #tpu.pipeline_mode<synchronous>, transform_indices = @transform_14, window_bounds = array<i64: 1, 48>}, {pipeline_mode = #tpu.pipeline_mode<synchronous>, transform_indices = @transform_15, window_bounds = array<i64: 48, 64>}, {pipeline_mode = #tpu.pipeline_mode<synchronous>, transform_indices = @transform_16, window_bounds = array<i64: 1, 64>}, {pipeline_mode = #tpu.pipeline_mode<synchronous>, transform_indices = @transform_17, window_bounds = array<i64: 64, 128>}, {pipeline_mode = #tpu.pipeline_mode<synchronous>, transform_indices = @transform_18, window_bounds = array<i64: 1, 128>}, {transform_indices = @transform_19, window_bounds = array<i64: 128, 128>}]} {
    %c0 = arith.constant 0 : index
    %c0_0 = arith.constant 0 : index
    %0 = vector.load %arg1[%c0, %c0_0] : memref<128x32xf32, #tpu.memory_space<vmem>>, vector<128x32xf32>
    %c0_1 = arith.constant 0 : index
    %c0_2 = arith.constant 0 : index
    %1 = vector.load %arg2[%c0_1, %c0_2] : memref<128x32xf32, #tpu.memory_space<vmem>>, vector<128x32xf32>
    %2 = arith.mulf %0, %1 : vector<128x32xf32>
    %3 = arith.truncf %2 : vector<128x32xf32> to vector<128x32xbf16>
    %c0_3 = arith.constant 0 : index
    %c0_4 = arith.constant 0 : index
    %4 = vector.load %arg8[%c0_3, %c0_4] : memref<32x64xbf16, #tpu.memory_space<vmem>>, vector<32x64xbf16>
    %cst = arith.constant dense<0.000000e+00> : vector<128x64xf32>
    %5 = tpu.matmul %3, %4, %cst {dimension_numbers = #tpu.dot_dimension_numbers<[1], [0], [0], [1], [0, 0, 1, 1], [], []>} : vector<128x32xbf16>, vector<32x64xbf16>, vector<128x64xf32> -> vector<128x64xf32>
    %c0_5 = arith.constant 0 : index
    %c0_6 = arith.constant 0 : index
    %6 = vector.load %arg9[%c0_5, %c0_6] : memref<1x64xf32, #tpu.memory_space<vmem>>, vector<1x64xf32>
    %7 = vector.broadcast %6 : vector<1x64xf32> to vector<128x64xf32>
    %8 = arith.addf %5, %7 : vector<128x64xf32>
    %cst_7 = arith.constant 0.000000e+00 : f32
    %9 = vector.broadcast %cst_7 : f32 to vector<128x64xf32>
    %10 = arith.maximumf %8, %9 : vector<128x64xf32>
    %c0_8 = arith.constant 0 : index
    %c0_9 = arith.constant 0 : index
    %11 = vector.load %arg3[%c0_8, %c0_9] : memref<128x64xf32, #tpu.memory_space<vmem>>, vector<128x64xf32>
    %12 = arith.mulf %10, %11 : vector<128x64xf32>
    %13 = arith.truncf %12 : vector<128x64xf32> to vector<128x64xbf16>
    %c0_10 = arith.constant 0 : index
    %c0_11 = arith.constant 0 : index
    %14 = vector.load %arg10[%c0_10, %c0_11] : memref<64x48xbf16, #tpu.memory_space<vmem>>, vector<64x48xbf16>
    %cst_12 = arith.constant dense<0.000000e+00> : vector<128x48xf32>
    %15 = tpu.matmul %13, %14, %cst_12 {dimension_numbers = #tpu.dot_dimension_numbers<[1], [0], [0], [1], [0, 0, 1, 1], [], []>} : vector<128x64xbf16>, vector<64x48xbf16>, vector<128x48xf32> -> vector<128x48xf32>
    %c0_13 = arith.constant 0 : index
    %c0_14 = arith.constant 0 : index
    %16 = vector.load %arg11[%c0_13, %c0_14] : memref<1x48xf32, #tpu.memory_space<vmem>>, vector<1x48xf32>
    %17 = vector.broadcast %16 : vector<1x48xf32> to vector<128x48xf32>
    %18 = arith.addf %15, %17 : vector<128x48xf32>
    %cst_15 = arith.constant 0.000000e+00 : f32
    %19 = vector.broadcast %cst_15 : f32 to vector<128x48xf32>
    %20 = arith.maximumf %18, %19 : vector<128x48xf32>
    %c0_16 = arith.constant 0 : index
    %c0_17 = arith.constant 0 : index
    %21 = vector.load %arg4[%c0_16, %c0_17] : memref<128x48xf32, #tpu.memory_space<vmem>>, vector<128x48xf32>
    %22 = arith.mulf %20, %21 : vector<128x48xf32>
    %23 = arith.truncf %22 : vector<128x48xf32> to vector<128x48xbf16>
    %c0_18 = arith.constant 0 : index
    %c0_19 = arith.constant 0 : index
    %24 = vector.load %arg12[%c0_18, %c0_19] : memref<48x16xbf16, #tpu.memory_space<vmem>>, vector<48x16xbf16>
    %cst_20 = arith.constant dense<0.000000e+00> : vector<128x16xf32>
    %25 = tpu.matmul %23, %24, %cst_20 {dimension_numbers = #tpu.dot_dimension_numbers<[1], [0], [0], [1], [0, 0, 1, 1], [], []>} : vector<128x48xbf16>, vector<48x16xbf16>, vector<128x16xf32> -> vector<128x16xf32>
    %c0_21 = arith.constant 0 : index
    %c0_22 = arith.constant 0 : index
    %26 = vector.load %arg13[%c0_21, %c0_22] : memref<1x16xf32, #tpu.memory_space<vmem>>, vector<1x16xf32>
    %27 = vector.broadcast %26 : vector<1x16xf32> to vector<128x16xf32>
    %28 = arith.addf %25, %27 : vector<128x16xf32>
    %cst_23 = arith.constant 0.000000e+00 : f32
    %29 = vector.broadcast %cst_23 : f32 to vector<128x16xf32>
    %30 = arith.maximumf %28, %29 : vector<128x16xf32>
    %c0_24 = arith.constant 0 : index
    %c0_25 = arith.constant 0 : index
    %31 = vector.load %arg5[%c0_24, %c0_25] : memref<128x16xf32, #tpu.memory_space<vmem>>, vector<128x16xf32>
    %32 = arith.mulf %30, %31 : vector<128x16xf32>
    %33 = arith.truncf %32 : vector<128x16xf32> to vector<128x16xbf16>
    %c0_26 = arith.constant 0 : index
    %c0_27 = arith.constant 0 : index
    %34 = vector.load %arg14[%c0_26, %c0_27] : memref<16x48xbf16, #tpu.memory_space<vmem>>, vector<16x48xbf16>
    %cst_28 = arith.constant dense<0.000000e+00> : vector<128x48xf32>
    %35 = tpu.matmul %33, %34, %cst_28 {dimension_numbers = #tpu.dot_dimension_numbers<[1], [0], [0], [1], [0, 0, 1, 1], [], []>} : vector<128x16xbf16>, vector<16x48xbf16>, vector<128x48xf32> -> vector<128x48xf32>
    %c0_29 = arith.constant 0 : index
    %c0_30 = arith.constant 0 : index
    %36 = vector.load %arg15[%c0_29, %c0_30] : memref<1x48xf32, #tpu.memory_space<vmem>>, vector<1x48xf32>
    %37 = vector.broadcast %36 : vector<1x48xf32> to vector<128x48xf32>
    %38 = arith.addf %35, %37 : vector<128x48xf32>
    %cst_31 = arith.constant 0.000000e+00 : f32
    %39 = vector.broadcast %cst_31 : f32 to vector<128x48xf32>
    %40 = arith.maximumf %38, %39 : vector<128x48xf32>
    %c0_32 = arith.constant 0 : index
    %c0_33 = arith.constant 0 : index
    %41 = vector.load %arg6[%c0_32, %c0_33] : memref<128x48xf32, #tpu.memory_space<vmem>>, vector<128x48xf32>
    %42 = arith.mulf %40, %41 : vector<128x48xf32>
    %43 = arith.truncf %42 : vector<128x48xf32> to vector<128x48xbf16>
    %c0_34 = arith.constant 0 : index
    %c0_35 = arith.constant 0 : index
    %44 = vector.load %arg16[%c0_34, %c0_35] : memref<48x64xbf16, #tpu.memory_space<vmem>>, vector<48x64xbf16>
    %cst_36 = arith.constant dense<0.000000e+00> : vector<128x64xf32>
    %45 = tpu.matmul %43, %44, %cst_36 {dimension_numbers = #tpu.dot_dimension_numbers<[1], [0], [0], [1], [0, 0, 1, 1], [], []>} : vector<128x48xbf16>, vector<48x64xbf16>, vector<128x64xf32> -> vector<128x64xf32>
    %c0_37 = arith.constant 0 : index
    %c0_38 = arith.constant 0 : index
    %46 = vector.load %arg17[%c0_37, %c0_38] : memref<1x64xf32, #tpu.memory_space<vmem>>, vector<1x64xf32>
    %47 = vector.broadcast %46 : vector<1x64xf32> to vector<128x64xf32>
    %48 = arith.addf %45, %47 : vector<128x64xf32>
    %cst_39 = arith.constant 0.000000e+00 : f32
    %49 = vector.broadcast %cst_39 : f32 to vector<128x64xf32>
    %50 = arith.maximumf %48, %49 : vector<128x64xf32>
    %c0_40 = arith.constant 0 : index
    %c0_41 = arith.constant 0 : index
    %51 = vector.load %arg7[%c0_40, %c0_41] : memref<128x64xf32, #tpu.memory_space<vmem>>, vector<128x64xf32>
    %52 = arith.mulf %50, %51 : vector<128x64xf32>
    %53 = arith.truncf %52 : vector<128x64xf32> to vector<128x64xbf16>
    %c0_42 = arith.constant 0 : index
    %c0_43 = arith.constant 0 : index
    %54 = vector.load %arg18[%c0_42, %c0_43] : memref<64x128xbf16, #tpu.memory_space<vmem>>, vector<64x128xbf16>
    %cst_44 = arith.constant dense<0.000000e+00> : vector<128x128xf32>
    %55 = tpu.matmul %53, %54, %cst_44 {dimension_numbers = #tpu.dot_dimension_numbers<[1], [0], [0], [1], [0, 0, 1, 1], [], []>} : vector<128x64xbf16>, vector<64x128xbf16>, vector<128x128xf32> -> vector<128x128xf32>
    %c0_45 = arith.constant 0 : index
    %c0_46 = arith.constant 0 : index
    %56 = vector.load %arg19[%c0_45, %c0_46] : memref<1x128xf32, #tpu.memory_space<vmem>>, vector<1x128xf32>
    %57 = vector.broadcast %56 : vector<1x128xf32> to vector<128x128xf32>
    %58 = arith.addf %55, %57 : vector<128x128xf32>
    %c0_47 = arith.constant 0 : index
    %c0_48 = arith.constant 0 : index
    %59 = vector.load %arg20[%c0_47, %c0_48] : memref<128x128xf32, #tpu.memory_space<vmem>>, vector<128x128xf32>
    tpu.vector_store %arg20[%c0_47, %c0_48], %58 {strides = array<i32>} : memref<128x128xf32, #tpu.memory_space<vmem>>, vector<128x128xf32>,
    return
  }
  func.func @transform_0(%arg0: i32) -> (i32, i32) {
    %c0_i32 = arith.constant 0 : i32
    %c0_i32_0 = arith.constant 0 : i32
    return %arg0, %c0_i32 : i32, i32
  }
  func.func @transform_1(%arg0: i32) -> (i32, i32) {
    %c0_i32 = arith.constant 0 : i32
    %c0_i32_0 = arith.constant 0 : i32
    return %arg0, %c0_i32 : i32, i32
  }
  func.func @transform_2(%arg0: i32) -> (i32, i32) {
    %c0_i32 = arith.constant 0 : i32
    %c0_i32_0 = arith.constant 0 : i32
    return %arg0, %c0_i32 : i32, i32
  }
  func.func @transform_3(%arg0: i32) -> (i32, i32) {
    %c0_i32 = arith.constant 0 : i32
    %c0_i32_0 = arith.constant 0 : i32
    return %arg0, %c0_i32 : i32, i32
  }
  func.func @transform_4(%arg0: i32) -> (i32, i32) {
    %c0_i32 = arith.constant 0 : i32
    %c0_i32_0 = arith.constant 0 : i32
    return %arg0, %c0_i32 : i32, i32
  }
  func.func @transform_5(%arg0: i32) -> (i32, i32) {
    %c0_i32 = arith.constant 0 : i32
    %c0_i32_0 = arith.constant 0 : i32
    return %arg0, %c0_i32 : i32, i32
  }
  func.func @transform_6(%arg0: i32) -> (i32, i32) {
    %c0_i32 = arith.constant 0 : i32
    %c0_i32_0 = arith.constant 0 : i32
    return %arg0, %c0_i32 : i32, i32
  }
  func.func @transform_7(%arg0: i32) -> (i32, i32) {
    %c0_i32 = arith.constant 0 : i32
    %c0_i32_0 = arith.constant 0 : i32
    %c0_i32_1 = arith.constant 0 : i32
    return %c0_i32, %c0_i32_0 : i32, i32
  }
  func.func @transform_8(%arg0: i32) -> (i32, i32) {
    %c0_i32 = arith.constant 0 : i32
    %c0_i32_0 = arith.constant 0 : i32
    %c0_i32_1 = arith.constant 0 : i32
    return %c0_i32, %c0_i32_0 : i32, i32
  }
  func.func @transform_9(%arg0: i32) -> (i32, i32) {
    %c0_i32 = arith.constant 0 : i32
    %c0_i32_0 = arith.constant 0 : i32
    %c0_i32_1 = arith.constant 0 : i32
    return %c0_i32, %c0_i32_0 : i32, i32
  }
  func.func @transform_10(%arg0: i32) -> (i32, i32) {
    %c0_i32 = arith.constant 0 : i32
    %c0_i32_0 = arith.constant 0 : i32
    %c0_i32_1 = arith.constant 0 : i32
    return %c0_i32, %c0_i32_0 : i32, i32
  }
  func.func @transform_11(%arg0: i32) -> (i32, i32) {
    %c0_i32 = arith.constant 0 : i32
    %c0_i32_0 = arith.constant 0 : i32
    %c0_i32_1 = arith.constant 0 : i32
    return %c0_i32, %c0_i32_0 : i32, i32
  }
  func.func @transform_12(%arg0: i32) -> (i32, i32) {
    %c0_i32 = arith.constant 0 : i32
    %c0_i32_0 = arith.constant 0 : i32
    %c0_i32_1 = arith.constant 0 : i32
    return %c0_i32, %c0_i32_0 : i32, i32
  }
  func.func @transform_13(%arg0: i32) -> (i32, i32) {
    %c0_i32 = arith.constant 0 : i32
    %c0_i32_0 = arith.constant 0 : i32
    %c0_i32_1 = arith.constant 0 : i32
    return %c0_i32, %c0_i32_0 : i32, i32
  }
  func.func @transform_14(%arg0: i32) -> (i32, i32) {
    %c0_i32 = arith.constant 0 : i32
    %c0_i32_0 = arith.constant 0 : i32
    %c0_i32_1 = arith.constant 0 : i32
    return %c0_i32, %c0_i32_0 : i32, i32
  }
  func.func @transform_15(%arg0: i32) -> (i32, i32) {
    %c0_i32 = arith.constant 0 : i32
    %c0_i32_0 = arith.constant 0 : i32
    %c0_i32_1 = arith.constant 0 : i32
    return %c0_i32, %c0_i32_0 : i32, i32
  }
  func.func @transform_16(%arg0: i32) -> (i32, i32) {
    %c0_i32 = arith.constant 0 : i32
    %c0_i32_0 = arith.constant 0 : i32
    %c0_i32_1 = arith.constant 0 : i32
    return %c0_i32, %c0_i32_0 : i32, i32
  }
  func.func @transform_17(%arg0: i32) -> (i32, i32) {
    %c0_i32 = arith.constant 0 : i32
    %c0_i32_0 = arith.constant 0 : i32
    %c0_i32_1 = arith.constant 0 : i32
    return %c0_i32, %c0_i32_0 : i32, i32
  }
  func.func @transform_18(%arg0: i32) -> (i32, i32) {
    %c0_i32 = arith.constant 0 : i32
    %c0_i32_0 = arith.constant 0 : i32
    %c0_i32_1 = arith.constant 0 : i32
    return %c0_i32, %c0_i32_0 : i32, i32
  }
  func.func @transform_19(%arg0: i32) -> (i32, i32) {
    %c0_i32 = arith.constant 0 : i32
    %c0_i32_0 = arith.constant 0 : i32
    return %arg0, %c0_i32 : i32, i32
  }
}

</mosaic_0001>

<bundles_post_ra>
// kernel: mlp_forward.3
= control target key start
LH: loop header
LB: loop body
LE: loop exit
PB: predicated region body
PF: predicated region fallthrough
CT: control target
= control target key end

     0   :  { %s2945_s0 = inlined_call_operand.vmem [shape: f32[256,32], index: 0, kind: input, shape index: {}]   ;;  %s2946_s1 = inlined_call_operand.vmem [shape: f32[256,32], index: 1, kind: input, shape index: {}]   ;;  %s2947_s2 = inlined_call_operand.vmem [shape: f32[256,64], index: 2, kind: input, shape index: {}]   ;;  %s2948_s3 = inlined_call_operand.vmem [shape: f32[256,48], index: 3, kind: input, shape index: {}]   ;;  %s2949_s4 = inlined_call_operand.vmem [shape: f32[256,16], index: 4, kind: input, shape index: {}]   ;;  %s2950_s5 = inlined_call_operand.vmem [shape: f32[256,48], index: 5, kind: input, shape index: {}]   ;;  %s2951_s6 = inlined_call_operand.vmem [shape: f32[256,64], index: 6, kind: input, shape index: {}]   ;;  %s2952_s7 = inlined_call_operand.vmem [shape: bf16[32,64], index: 7, kind: input, shape index: {}]   ;;  %s2953_s8 = inlined_call_operand.vmem [shape: f32[1,64], index: 8, kind: input, shape index: {}]   ;;  %s2954_s9 = inlined_call_operand.vmem [shape: bf16[64,48], index: 9, kind: input, shape index: {}]   ;;  %s2955_s10 = inlined_call_operand.vmem [shape: f32[1,48], index: 10, kind: input, shape index: {}]   ;;  %s2956_s11 = inlined_call_operand.vmem [shape: bf16[48,16], index: 11, kind: input, shape index: {}]   ;;  %s2957_s12 = inlined_call_operand.vmem [shape: f32[1,16], index: 12, kind: input, shape index: {}]   ;;  %s2958_s13 = inlined_call_operand.vmem [shape: bf16[16,48], index: 13, kind: input, shape index: {}]   ;;  %s2959_s14 = inlined_call_operand.vmem [shape: f32[1,48], index: 14, kind: input, shape index: {}]   ;;  %s2960_s15 = inlined_call_operand.vmem [shape: bf16[48,64], index: 15, kind: input, shape index: {}]   ;;  %s2961_s16 = inlined_call_operand.vmem [shape: f32[1,64], index: 16, kind: input, shape index: {}]   ;;  %s2962_s17 = inlined_call_operand.vmem [shape: bf16[64,128], index: 17, kind: input, shape index: {}]   ;;  %s2963_s18 = inlined_call_operand.vmem [shape: f32[1,128], index: 18, kind: input, shape index: {}]   ;;  %s2964_s19 = inlined_call_operand.vmem [shape: f32[256,128], index: 19, kind: output, shape index: {}]  }
   0x1   :  { %2965 = sst [smem:[#allocation2_spill]] %s2945_s0  ;;  %s2549_s0 = smov 0  }
   0x2   :  { %2966 = sst [smem:[#allocation3_spill]] %s2946_s1 }
   0x3   :  { %2967 = sst [smem:[#allocation4_spill]] %s2947_s2 }
   0x4   :  { %2968 = sst [smem:[#allocation5_spill]] %s2948_s3 }
   0x5 LB: > { %s2127_s30 = sadd.s32 4294967295, %s2447_s0   ;;  %p2131_p0 = scmp.ge.s32.totalorder %s2447_s0, 1  ;;  %s2447_s0 = sphi %s2549_s0, %s29_s0  }
   0x6   : > { %p604_p1 = scmp.lt.s32.totalorder %s2447_s0, 3 }
   0x8   : > { %p605_p2 = pnand %p2131_p0, %p604_p1 }
   0x9   : > { %v2424_v0 = vld [vmem:[%s2952_s7] sm:$0xff] (!%p605_p2)   ;;  %s2132_s1 = sshll.u32 (!%p605_p2), %s2127_s30, 4  ;;  %v2425_v1 = vld [vmem:[%s2952_s7 + $0x8] sm:$0xff] (!%p605_p2)   ;;  %s2969_s27 = sld [smem:[#allocation2_spill]] (!%p605_p2)  ;;  %vm818_vm0 = vcmask (!%p605_p2), 261120   ;;  %v2428_v60 = vld [vmem:[%s2954_s9 + $0x10] sm:$0xff] (!%p605_p2)  }
   0xa   : > { %608 = sbr.rel (%p605_p2) target bundleno = 1389 (0x56d), region = 96  ;;  %p691_p3 = scmp.lt.s32.totalorder (!%p605_p2), %s2132_s1, 31  ;;  %2286 = vmatprep.subr.bf16.mxu0 (!%p605_p2), %v2424_v0  ;;  %v2426_v2 = vld [vmem:[%s2954_s9] sm:$0xff] (!%p605_p2)   ;;  %v2427_v59 = vld [vmem:[%s2954_s9 + $0x8] sm:$0xff] (!%p605_p2)   ;;  %v2429_v61 = vld [vmem:[%s2954_s9 + $0x18] sm:$0xff] (!%p605_p2)   ;;  %vm1035_vm1 = vcmask (!%p605_p2), 523264  }
   0xb   : > { %2287 = vmatpush3.bf16.msra.mxu0 (!%p605_p2), %v2424_v0  ;;  %2306 = vmatprep.subr.bf16.mxu1 (!%p605_p2), %v2426_v2  ;;  %s2970_s20 = sld [smem:[#allocation3_spill]] (!%p605_p2)  ;;  %v2430_v62 = vld [vmem:[%s2956_s11] sm:$0xff] (!%p605_p2)   ;;  %v2431_v63 = vld [vmem:[%s2956_s11 + $0x8] sm:$0xff] (!%p605_p2)   ;;  %s2971_s22 = sld [smem:[#allocation4_spill]] (!%p605_p2)  ;;  %vm1244_vm2 = vcmask (!%p605_p2), 392192   ;;  %vm1437_vm3 = vcmask (!%p605_p2), 130048  }
   0xc   : > { %2288 = vmatprep.subr.bf16.mxu0 (!%p605_p2), %v2425_v1  ;;  %2307 = vmatpush3.bf16.msra.mxu1 (!%p605_p2), %v2426_v2  ;;  %v2638_v0 = vld [vmem:[%s2953_s8] ss:$0 sm:$0xff] (!%p605_p2) }
   0xd   : > { %2308 = vmatprep.subr.bf16.mxu1 (!%p605_p2), %v2427_v59 }
   0xf   : > { %2289 = vmatpush3.bf16.msra.mxu0 (!%p605_p2), %v2425_v1 }
  0x10   : > { %2309 = vmatpush3.bf16.msra.mxu1 (!%p605_p2), %v2427_v59  ;;  %2330 = vmatprep.subr.bf16.mxu0 (!%p605_p2), %v2430_v62 }
  0x11   : > { %s2974_s1 = smov (!%p691_p3, %s2132_s1), 31  ;;  %2310 = vmatprep.subr.bf16.mxu1 %v2428_v60 }
  0x12   : > { %s2566_s25 = sshll.u32 %s2974_s1, 3 }
  0x13   : > { %s2572_s28 = scalar_lea.vmem %s2969_s27, %s2566_s25  ;;  %s2578_s21 = scalar_lea.vmem %s2970_s20, %s2566_s25 }
  0x14   : > { %v739_v3 = vld [vmem:[%s2572_s28] sm:$0xff]  ;;  %v740_v4 = vld [vmem:[%s2572_s28 + $0x8] sm:$0xff]  ;;  %v741_v8 = vld [vmem:[%s2572_s28 + $0x10] sm:$0xff]  ;;  %2311 = vmatpush3.bf16.msra.mxu1 %v2428_v60  ;;  %s2644_s2 = scalar_lea.vmem %s2971_s22, %s2566_s25  ;;  %s2972_s20 = sld [smem:[#allocation5_spill]] }
  0x15   : > { %v755_v5 = vld [vmem:[%s2578_s21] sm:$0xff]  ;;  %v756_v6 = vld [vmem:[%s2578_s21 + $0x8] sm:$0xff]  ;;  %v742_v9 = vld [vmem:[%s2572_s28 + $0x18] sm:$0xff]  ;;  %2312 = vmatprep.subr.bf16.mxu1 %v2429_v61  ;;  %s2924_s27 = scalar_lea.vmem %s2964_s19, %s2566_s25 }
  0x16   : > { %v771_v7 = vmul.f32 %v755_v5, %v739_v3  ;;  %v772_v10 = vmul.f32 %v756_v6, %v740_v4  ;;  %v757_v11 = vld [vmem:[%s2578_s21 + $0x10] sm:$0xff]  ;;  %v758_v12 = vld [vmem:[%s2578_s21 + $0x18] sm:$0xff]  ;;  %v743_v13 = vld [vmem:[%s2572_s28 + $0x20] sm:$0xff] }
  0x17   : > { %v773_v14 = vmul.f32 %v757_v11, %v741_v8  ;;  %v774_v15 = vmul.f32 %v758_v12, %v742_v9  ;;  %v744_v16 = vld [vmem:[%s2572_s28 + $0x28] sm:$0xff]  ;;  %v759_v17 = vld [vmem:[%s2578_s21 + $0x20] sm:$0xff]  ;;  %v745_v22 = vld [vmem:[%s2572_s28 + $0x30] sm:$0xff] }
  0x18   : > { %v760_v18 = vld [vmem:[%s2578_s21 + $0x28] sm:$0xff]  ;;  %v787_v19 = vpack.c.bf16 %v772_v10, %v771_v7  ;;  %v775_v20 = vmul.f32 %v759_v17, %v743_v13  ;;  %v746_v23 = vld [vmem:[%s2572_s28 + $0x38] sm:$0xff]  ;;  %v761_v24 = vld [vmem:[%s2578_s21 + $0x30] sm:$0xff]  ;;  %2313 = vmatpush3.bf16.msra.mxu1 %v2429_v61 }
  0x19   : > { %v776_v21 = vmul.f32 %v760_v18, %v744_v16  ;;  %v788_v25 = vpack.c.bf16 %v774_v15, %v773_v14  ;;  %v762_v26 = vld [vmem:[%s2578_s21 + $0x38] sm:$0xff]  ;;  %v747_v27 = vld [vmem:[%s2572_s28 + $0x40] sm:$0xff]  ;;  %v748_v28 = vld [vmem:[%s2572_s28 + $0x48] sm:$0xff]  ;;  %v777_v32 = vmul.f32 %v761_v24, %v745_v22 }
  0x1a   : > { %2290 = vmatprep.mubr.msk.bf16.mxu0 %vm818_vm0, %v787_v19  ;;  %v763_v30 = vld [vmem:[%s2578_s21 + $0x40] sm:$0xff]  ;;  %v764_v31 = vld [vmem:[%s2578_s21 + $0x48] sm:$0xff]  ;;  %v778_v33 = vmul.f32 %v762_v26, %v746_v23  ;;  %v749_v36 = vld [vmem:[%s2572_s28 + $0x50] sm:$0xff] }
  0x1b   : > { %v789_v29 = vpack.c.bf16 %v776_v21, %v775_v20  ;;  %2291 = vmatmul.mubr.msk.bf16.vlgmr.msra.gmra.mrb[0].mxu0 %vm818_vm0, %v788_v25  ;;  %v779_v34 = vmul.f32 %v763_v30, %v747_v27  ;;  %v780_v35 = vmul.f32 %v764_v31, %v748_v28  ;;  %v750_v37 = vld [vmem:[%s2572_s28 + $0x58] sm:$0xff]  ;;  %v765_v38 = vld [vmem:[%s2578_s21 + $0x50] sm:$0xff]  ;;  %v751_v41 = vld [vmem:[%s2572_s28 + $0x60] sm:$0xff] }
  0x1c   : > { %v766_v39 = vld [vmem:[%s2578_s21 + $0x58] sm:$0xff]  ;;  %v790_v40 = vpack.c.bf16 %v778_v33, %v777_v32  ;;  %v752_v42 = vld [vmem:[%s2572_s28 + $0x68] sm:$0xff]  ;;  %v767_v43 = vld [vmem:[%s2578_s21 + $0x60] sm:$0xff]  ;;  %v781_v46 = vmul.f32 %v765_v38, %v749_v36  ;;  %2331 = vmatpush3.bf16.msra.mxu0 %v2430_v62 }
  0x1d   : > { %2294 = vmatprep.mubr.msk.bf16.mxu0 %vm818_vm0, %v789_v29  ;;  %v768_v44 = vld [vmem:[%s2578_s21 + $0x68] sm:$0xff]  ;;  %v791_v45 = vpack.c.bf16 %v780_v35, %v779_v34  ;;  %v782_v47 = vmul.f32 %v766_v39, %v750_v37  ;;  %v783_v48 = vmul.f32 %v767_v43, %v751_v41  ;;  %v753_v51 = vld [vmem:[%s2572_s28 + $0x70] sm:$0xff]  ;;  %v754_v53 = vld [vmem:[%s2572_s28 + $0x78] sm:$0xff]  ;;  %2332 = vmatprep.subr.bf16.mxu0 %v2431_v63  ;;  %s2758_s28 = scalar_lea.vmem %s2949_s4, %s2566_s25 }
  0x1e   : > { %v784_v49 = vmul.f32 %v768_v44, %v752_v42  ;;  %v769_v54 = vld [vmem:[%s2578_s21 + $0x70] sm:$0xff]  ;;  %v770_v55 = vld [vmem:[%s2578_s21 + $0x78] sm:$0xff]  ;;  %v956_v13 = vld [vmem:[%s2644_s2] sm:$0xff]  ;;  %s2701_s21 = scalar_lea.vmem %s2972_s20, %s2566_s25 }
  0x1f   : > { %v792_v50 = vpack.c.bf16 %v782_v47, %v781_v46  ;;  %v785_v56 = vmul.f32 %v769_v54, %v753_v51  ;;  %v786_v57 = vmul.f32 %v770_v55, %v754_v53  ;;  %v958_v9 = vld [vmem:[%s2644_s2 + $0x10] sm:$0xff]  ;;  %v959_v11 = vld [vmem:[%s2644_s2 + $0x18] sm:$0xff]  ;;  %v957_v15 = vld [vmem:[%s2644_s2 + $0x8] sm:$0xff] }
  0x20   : > { %v793_v52 = vpack.c.bf16 %v784_v49, %v783_v48  ;;  %2333 = vmatpush3.bf16.msra.mxu0 %v2431_v63  ;;  %v962_v31 = vld [vmem:[%s2644_s2 + $0x30] sm:$0xff]  ;;  %v963_v33 = vld [vmem:[%s2644_s2 + $0x38] sm:$0xff]  ;;  %v960_v35 = vld [vmem:[%s2644_s2 + $0x20] sm:$0xff] }
  0x21   : > { %v794_v58 = vpack.c.bf16 %v786_v57, %v785_v56  ;;  %v961_v37 = vld [vmem:[%s2644_s2 + $0x28] sm:$0xff]  ;;  %v966_v53 = vld [vmem:[%s2644_s2 + $0x50] sm:$0xff]  ;;  %v967_v55 = vld [vmem:[%s2644_s2 + $0x58] sm:$0xff] }
  0x22   : > { %v964_v57 = vld [vmem:[%s2644_s2 + $0x40] sm:$0xff]  ;;  %v965_v59 = vld [vmem:[%s2644_s2 + $0x48] sm:$0xff] }
  0x23   : > { %2295 = vmatmul.mubr.msk.bf16.gmra.mrb[4].mxu0 %vm818_vm0, %v790_v40 }
  0x24   : > { %2298 = vmatprep.mubr.msk.bf16.mxu0 %vm818_vm0, %v791_v45 }
  0x2b   : > { %2299 = vmatmul.mubr.msk.bf16.gmra.mrb[8].mxu0 %vm818_vm0, %v792_v50 }
  0x2c   : > { %2302 = vmatprep.mubr.msk.bf16.mxu0 %vm818_vm0, %v793_v52 }
  0x33   : > { %2303 = vmatmul.mubr.msk.bf16.gmra.mrb[12].mxu0 %vm818_vm0, %v794_v58 }
  0xee   : > { %v2292_v1 = vpop.f32.mrb[0].mxu0 }
  0xef   : > { %v886_v2 = vadd.f32 %v2292_v1, %v2638_v0  ;;  %v877_v3 = vpop.f32.mrb[1].mxu0 }
  0xf0   : > { %v878_v4 = vadd.f32 %v2638_v0, %v877_v3  ;;  %v2293_v5 = vpop.f32.mrb[2].mxu0 }
  0xf1   : > { %v942_v6 = vmax.f32 %v886_v2, 0.0  ;;  %v889_v7 = vadd.f32 %v2293_v5, %v2638_v0  ;;  %v880_v8 = vpop.f32.mrb[3].mxu0 }
  0xf2   : > { %v940_v10 = vmax.f32 %v878_v4, 0.0  ;;  %v881_v12 = vadd.f32 %v2638_v0, %v880_v8 }
  0xf3   : > { %v943_v14 = vmax.f32 %v889_v7, 0.0  ;;  %v974_v17 = vmul.f32 %v958_v9, %v942_v6 }
  0xf4   : > { %v941_v16 = vmax.f32 %v881_v12, 0.0  ;;  %v972_v19 = vmul.f32 %v956_v13, %v940_v10  ;;  %v970_v12 = vld [vmem:[%s2644_s2 + $0x70] sm:$0xff] }
  0xf5   : > { %v975_v18 = vmul.f32 %v959_v11, %v943_v14  ;;  %v971_v14 = vld [vmem:[%s2644_s2 + $0x78] sm:$0xff] }
  0xf6   : > { %v973_v20 = vmul.f32 %v957_v15, %v941_v16  ;;  %v2296_v21 = vpop.f32.mrb[4].mxu0  ;;  %v968_v16 = vld [vmem:[%s2644_s2 + $0x60] sm:$0xff] }
  0xf7   : > { %v989_v22 = vpack.c.bf16 %v975_v18, %v974_v17  ;;  %v902_v23 = vadd.f32 %v2296_v21, %v2638_v0  ;;  %v893_v24 = vpop.f32.mrb[5].mxu0  ;;  %v969_v18 = vld [vmem:[%s2644_s2 + $0x68] sm:$0xff]  ;;  %s2875_s2 = scalar_lea.vmem %s2951_s6, %s2566_s25 }
  0xf8   : > { %v894_v25 = vadd.f32 %v2638_v0, %v893_v24  ;;  %v2297_v26 = vpop.f32.mrb[6].mxu0  ;;  %v988_v27 = vpack.c.bf16 %v973_v20, %v972_v19 }
  0xf9   : > { %v946_v28 = vmax.f32 %v902_v23, 0.0  ;;  %v905_v29 = vadd.f32 %v2297_v26, %v2638_v0  ;;  %v896_v30 = vpop.f32.mrb[7].mxu0  ;;  %v2433_v26 = vld [vmem:[%s2958_s13] sm:$0xff]  }
  0xfa   : > { %v944_v32 = vmax.f32 %v894_v25, 0.0  ;;  %v897_v34 = vadd.f32 %v2638_v0, %v896_v30  ;;  %2314 = vmatprep.mubr.msk.bf16.mxu1 %vm1035_vm1, %v988_v27  ;;  %2352 = vmatprep.subr.bf16.mxu1 %v2433_v26  ;;  %v2695_v27 = vld [vmem:[%s2955_s10] ss:$0 sm:$0xff] }
  0xfb   : > { %v947_v36 = vmax.f32 %v905_v29, 0.0  ;;  %2315 = vmatmul.mubr.msk.bf16.vlgmr.msra.gmra.mrb[0].mxu1 %vm1035_vm1, %v989_v22  ;;  %v978_v39 = vmul.f32 %v962_v31, %v946_v28 }
  0xfc   : > { %v945_v38 = vmax.f32 %v897_v34, 0.0  ;;  %v976_v41 = vmul.f32 %v960_v35, %v944_v32  ;;  %2353 = vmatpush3.bf16.msra.mxu1 %v2433_v26 }
  0xfd   : > { %v979_v40 = vmul.f32 %v963_v33, %v947_v36  ;;  %v1175_v36 = vld [vmem:[%s2701_s21 + $0x10] sm:$0xff] }
  0xfe   : > { %v977_v42 = vmul.f32 %v961_v37, %v945_v38  ;;  %v2300_v43 = vpop.f32.mrb[8].mxu0  ;;  %v1176_v38 = vld [vmem:[%s2701_s21 + $0x18] sm:$0xff] }
  0xff   : > { %v991_v44 = vpack.c.bf16 %v979_v40, %v978_v39  ;;  %v918_v45 = vadd.f32 %v2300_v43, %v2638_v0  ;;  %v909_v46 = vpop.f32.mrb[9].mxu0  ;;  %v1173_v40 = vld [vmem:[%s2701_s21] sm:$0xff] }
 0x100   : > { %v990_v47 = vpack.c.bf16 %v977_v42, %v976_v41  ;;  %v910_v48 = vadd.f32 %v2638_v0, %v909_v46  ;;  %v2301_v49 = vpop.f32.mrb[10].mxu0  ;;  %v1174_v42 = vld [vmem:[%s2701_s21 + $0x8] sm:$0xff] }
 0x101   : > { %v950_v50 = vmax.f32 %v918_v45, 0.0  ;;  %v921_v51 = vadd.f32 %v2301_v49, %v2638_v0  ;;  %v912_v52 = vpop.f32.mrb[11].mxu0 }
 0x102   : > { %v948_v54 = vmax.f32 %v910_v48, 0.0  ;;  %v913_v56 = vadd.f32 %v2638_v0, %v912_v52  ;;  %2318 = vmatprep.mubr.msk.bf16.mxu1 %vm1035_vm1, %v990_v47 }
 0x103   : > { %v951_v58 = vmax.f32 %v921_v51, 0.0  ;;  %2319 = vmatmul.mubr.msk.bf16.gmra.mrb[4].mxu1 %vm1035_vm1, %v991_v44  ;;  %v982_v61 = vmul.f32 %v966_v53, %v950_v50 }
 0x104   : > { %v949_v60 = vmax.f32 %v913_v56, 0.0  ;;  %v980_v63 = vmul.f32 %v964_v57, %v948_v54 }
 0x105   : > { %v983_v62 = vmul.f32 %v967_v55, %v951_v58  ;;  %v1179_v58 = vld [vmem:[%s2701_s21 + $0x30] sm:$0xff] }
 0x106   : > { %v981_v1 = vmul.f32 %v965_v59, %v949_v60  ;;  %v2304_v2 = vpop.f32.mrb[12].mxu0  ;;  %v1180_v60 = vld [vmem:[%s2701_s21 + $0x38] sm:$0xff] }
 0x107   : > { %v993_v3 = vpack.c.bf16 %v983_v62, %v982_v61  ;;  %v934_v4 = vadd.f32 %v2304_v2, %v2638_v0  ;;  %v925_v5 = vpop.f32.mrb[13].mxu0  ;;  %v1177_v62 = vld [vmem:[%s2701_s21 + $0x20] sm:$0xff] }
 0x108   : > { %v992_v6 = vpack.c.bf16 %v981_v1, %v980_v63  ;;  %v926_v7 = vadd.f32 %v2638_v0, %v925_v5  ;;  %v2305_v8 = vpop.f32.mrb[14].mxu0  ;;  %v1178_v1 = vld [vmem:[%s2701_s21 + $0x28] sm:$0xff] }
 0x109   : > { %v954_v9 = vmax.f32 %v934_v4, 0.0  ;;  %v937_v10 = vadd.f32 %v2305_v8, %v2638_v0  ;;  %v928_v11 = vpop.f32.mrb[15].mxu0 }
 0x10a   : > { %v952_v13 = vmax.f32 %v926_v7, 0.0  ;;  %v929_v15 = vadd.f32 %v2638_v0, %v928_v11  ;;  %2322 = vmatprep.mubr.msk.bf16.mxu1 %vm1035_vm1, %v992_v6  ;;  %v2432_v0 = vld [vmem:[%s2956_s11 + $0x10] sm:$0xff]  }
 0x10b   : > { %v955_v17 = vmax.f32 %v937_v10, 0.0  ;;  %2323 = vmatmul.mubr.msk.bf16.gmra.mrb[8].mxu1 %vm1035_vm1, %v993_v3  ;;  %v986_v20 = vmul.f32 %v970_v12, %v954_v9  ;;  %2334 = vmatprep.subr.bf16.mxu0 %v2432_v0 }
 0x10c   : > { %v953_v19 = vmax.f32 %v929_v15, 0.0  ;;  %v984_v22 = vmul.f32 %v968_v16, %v952_v13  ;;  %2335 = vmatpush3.bf16.msra.mxu0 %v2432_v0 }
 0x10d   : > { %v987_v21 = vmul.f32 %v971_v14, %v955_v17  ;;  %v1183_v17 = vld [vmem:[%s2701_s21 + $0x50] sm:$0xff] }
 0x10e   : > { %v985_v23 = vmul.f32 %v969_v18, %v953_v19  ;;  %v1184_v19 = vld [vmem:[%s2701_s21 + $0x58] sm:$0xff] }
 0x10f   : > { %v995_v24 = vpack.c.bf16 %v987_v21, %v986_v20  ;;  %v1181_v21 = vld [vmem:[%s2701_s21 + $0x40] sm:$0xff] }
 0x110   : > { %v994_v25 = vpack.c.bf16 %v985_v23, %v984_v22  ;;  %v1182_v23 = vld [vmem:[%s2701_s21 + $0x48] sm:$0xff] }
 0x112   : > { %2326 = vmatprep.mubr.msk.bf16.mxu1 %vm1035_vm1, %v994_v25 }
 0x113   : > { %2327 = vmatmul.mubr.msk.bf16.gmra.mrb[12].mxu1 %vm1035_vm1, %v995_v24 }
 0x1ce   : > { %v2316_v28 = vpop.f32.mrb[0].mxu1 }
 0x1cf   : > { %v1103_v29 = vadd.f32 %v2316_v28, %v2695_v27  ;;  %v1094_v30 = vpop.f32.mrb[1].mxu1 }
 0x1d0   : > { %v1095_v31 = vadd.f32 %v2695_v27, %v1094_v30  ;;  %v2317_v32 = vpop.f32.mrb[2].mxu1 }
 0x1d1   : > { %v1159_v33 = vmax.f32 %v1103_v29, 0.0  ;;  %v1106_v34 = vadd.f32 %v2317_v32, %v2695_v27  ;;  %v1097_v35 = vpop.f32.mrb[3].mxu1 }
 0x1d2   : > { %v1157_v37 = vmax.f32 %v1095_v31, 0.0  ;;  %v1098_v39 = vadd.f32 %v2695_v27, %v1097_v35 }
 0x1d3   : > { %v1160_v41 = vmax.f32 %v1106_v34, 0.0  ;;  %v1191_v44 = vmul.f32 %v1175_v36, %v1159_v33 }
 0x1d4   : > { %v1158_v43 = vmax.f32 %v1098_v39, 0.0  ;;  %v1189_v46 = vmul.f32 %v1173_v40, %v1157_v37  ;;  %v1187_v39 = vld [vmem:[%s2701_s21 + $0x70] sm:$0xff] }
 0x1d5   : > { %v1192_v45 = vmul.f32 %v1176_v38, %v1160_v41  ;;  %v1188_v41 = vld [vmem:[%s2701_s21 + $0x78] sm:$0xff] }
 0x1d6   : > { %v1190_v47 = vmul.f32 %v1174_v42, %v1158_v43  ;;  %v2320_v48 = vpop.f32.mrb[4].mxu1  ;;  %v1185_v43 = vld [vmem:[%s2701_s21 + $0x60] sm:$0xff] }
 0x1d7   : > { %v1206_v49 = vpack.c.bf16 %v1192_v45, %v1191_v44  ;;  %v1119_v50 = vadd.f32 %v2320_v48, %v2695_v27  ;;  %v1110_v51 = vpop.f32.mrb[5].mxu1  ;;  %v1186_v45 = vld [vmem:[%s2701_s21 + $0x68] sm:$0xff] }
 0x1d8   : > { %v1205_v52 = vpack.c.bf16 %v1190_v47, %v1189_v46  ;;  %v1111_v53 = vadd.f32 %v2695_v27, %v1110_v51  ;;  %v2321_v54 = vpop.f32.mrb[6].mxu1 }
 0x1d9   : > { %v1163_v55 = vmax.f32 %v1119_v50, 0.0  ;;  %v1122_v56 = vadd.f32 %v2321_v54, %v2695_v27  ;;  %v1113_v57 = vpop.f32.mrb[7].mxu1  ;;  %v2752_v54 = vld [vmem:[%s2957_s12] ss:$0 sm:$0xff] }
 0x1da   : > { %v1161_v59 = vmax.f32 %v1111_v53, 0.0  ;;  %v1114_v61 = vadd.f32 %v2695_v27, %v1113_v57  ;;  %2336 = vmatprep.mubr.msk.bf16.mxu0 %vm1244_vm2, %v1205_v52  ;;  %v2435_v53 = vld [vmem:[%s2960_s15 + $0x8] sm:$0xff]  }
 0x1db   : > { %v1164_v63 = vmax.f32 %v1122_v56, 0.0  ;;  %2337 = vmatmul.mubr.msk.bf16.vlgmr.msra.gmra.mrb[16].mxu0 %vm1244_vm2, %v1206_v49  ;;  %v1195_v3 = vmul.f32 %v1179_v58, %v1163_v55 }
 0x1dc   : > { %v1162_v2 = vmax.f32 %v1114_v61, 0.0  ;;  %v1193_v5 = vmul.f32 %v1177_v62, %v1161_v59 }
 0x1dd   : > { %v1196_v4 = vmul.f32 %v1180_v60, %v1164_v63  ;;  %v1384_v63 = vld [vmem:[%s2758_s28 + $0x10] sm:$0xff] }
 0x1de   : > { %v1194_v6 = vmul.f32 %v1178_v1, %v1162_v2  ;;  %v2324_v7 = vpop.f32.mrb[8].mxu1  ;;  %v1385_v2 = vld [vmem:[%s2758_s28 + $0x18] sm:$0xff] }
 0x1df   : > { %v1208_v8 = vpack.c.bf16 %v1196_v4, %v1195_v3  ;;  %v1135_v9 = vadd.f32 %v2324_v7, %v2695_v27  ;;  %v1126_v10 = vpop.f32.mrb[9].mxu1  ;;  %v1382_v4 = vld [vmem:[%s2758_s28] sm:$0xff] }
 0x1e0   : > { %v1207_v11 = vpack.c.bf16 %v1194_v6, %v1193_v5  ;;  %v1127_v12 = vadd.f32 %v2695_v27, %v1126_v10  ;;  %v2325_v13 = vpop.f32.mrb[10].mxu1  ;;  %v1383_v6 = vld [vmem:[%s2758_s28 + $0x8] sm:$0xff] }
 0x1e1   : > { %v1167_v14 = vmax.f32 %v1135_v9, 0.0  ;;  %v1138_v15 = vadd.f32 %v2325_v13, %v2695_v27  ;;  %v1129_v16 = vpop.f32.mrb[11].mxu1 }
 0x1e2   : > { %v1165_v18 = vmax.f32 %v1127_v12, 0.0  ;;  %v1130_v20 = vadd.f32 %v2695_v27, %v1129_v16  ;;  %2340 = vmatprep.mubr.msk.bf16.mxu0 %vm1244_vm2, %v1207_v11 }
 0x1e3   : > { %v1168_v22 = vmax.f32 %v1138_v15, 0.0  ;;  %2341 = vmatmul.mubr.msk.bf16.gmra.mrb[20].mxu0 %vm1244_vm2, %v1208_v8  ;;  %v1199_v25 = vmul.f32 %v1183_v17, %v1167_v14 }
 0x1e4   : > { %v1166_v24 = vmax.f32 %v1130_v20, 0.0  ;;  %v1197_v26 = vmul.f32 %v1181_v21, %v1165_v18 }
 0x1e5   : > { %v1200_v0 = vmul.f32 %v1184_v19, %v1168_v22  ;;  %v1388_v22 = vld [vmem:[%s2758_s28 + $0x30] sm:$0xff] }
 0x1e6   : > { %v1198_v28 = vmul.f32 %v1182_v23, %v1166_v24  ;;  %v2328_v29 = vpop.f32.mrb[12].mxu1  ;;  %v1389_v24 = vld [vmem:[%s2758_s28 + $0x38] sm:$0xff] }
 0x1e7   : > { %v1210_v30 = vpack.c.bf16 %v1200_v0, %v1199_v25  ;;  %v1151_v31 = vadd.f32 %v2328_v29, %v2695_v27  ;;  %v1142_v32 = vpop.f32.mrb[13].mxu1  ;;  %v1386_v0 = vld [vmem:[%s2758_s28 + $0x20] sm:$0xff] }
 0x1e8   : > { %v1209_v33 = vpack.c.bf16 %v1198_v28, %v1197_v26  ;;  %v1143_v34 = vadd.f32 %v2695_v27, %v1142_v32  ;;  %v2329_v35 = vpop.f32.mrb[14].mxu1  ;;  %v1387_v28 = vld [vmem:[%s2758_s28 + $0x28] sm:$0xff] }
 0x1e9   : > { %v1171_v36 = vmax.f32 %v1151_v31, 0.0  ;;  %v1154_v37 = vadd.f32 %v2329_v35, %v2695_v27  ;;  %v1145_v38 = vpop.f32.mrb[15].mxu1 }
 0x1ea   : > { %v1169_v40 = vmax.f32 %v1143_v34, 0.0  ;;  %v1146_v42 = vadd.f32 %v2695_v27, %v1145_v38  ;;  %2344 = vmatprep.mubr.msk.bf16.mxu0 %vm1244_vm2, %v1209_v33  ;;  %v2434_v27 = vld [vmem:[%s2960_s15] sm:$0xff]  }
 0x1eb   : > { %v1172_v44 = vmax.f32 %v1154_v37, 0.0  ;;  %2345 = vmatmul.mubr.msk.bf16.gmra.mrb[24].mxu0 %vm1244_vm2, %v1210_v30  ;;  %v1203_v47 = vmul.f32 %v1187_v39, %v1171_v36  ;;  %2370 = vmatprep.subr.bf16.mxu0 %v2434_v27 }
 0x1ec   : > { %v1170_v46 = vmax.f32 %v1146_v42, 0.0  ;;  %v1201_v49 = vmul.f32 %v1185_v43, %v1169_v40  ;;  %2371 = vmatpush3.bf16.msra.mxu0 %v2434_v27 }
 0x1ed   : > { %v1204_v48 = vmul.f32 %v1188_v41, %v1172_v44  ;;  %2372 = vmatprep.subr.bf16.mxu0 %v2435_v53  ;;  %v1392_v44 = vld [vmem:[%s2758_s28 + $0x50] sm:$0xff] }
 0x1ee   : > { %v1202_v50 = vmul.f32 %v1186_v45, %v1170_v46  ;;  %v1393_v46 = vld [vmem:[%s2758_s28 + $0x58] sm:$0xff] }
 0x1ef   : > { %v1212_v51 = vpack.c.bf16 %v1204_v48, %v1203_v47  ;;  %v1390_v48 = vld [vmem:[%s2758_s28 + $0x40] sm:$0xff] }
 0x1f0   : > { %v1211_v52 = vpack.c.bf16 %v1202_v50, %v1201_v49  ;;  %2373 = vmatpush3.bf16.msra.mxu0 %v2435_v53  ;;  %v1391_v50 = vld [vmem:[%s2758_s28 + $0x48] sm:$0xff] }
 0x1f2   : > { %2348 = vmatprep.mubr.msk.bf16.mxu0 %vm1244_vm2, %v1211_v52 }
 0x1f3   : > { %2349 = vmatmul.mubr.msk.bf16.gmra.mrb[28].mxu0 %vm1244_vm2, %v1212_v51 }
 0x2ae   : > { %v2338_v55 = vpop.f32.mrb[16].mxu0 }
 0x2af   : > { %v1312_v56 = vadd.f32 %v2338_v55, %v2752_v54  ;;  %v1303_v57 = vpop.f32.mrb[17].mxu0 }
 0x2b0   : > { %v1304_v58 = vadd.f32 %v2752_v54, %v1303_v57  ;;  %v2339_v59 = vpop.f32.mrb[18].mxu0 }
 0x2b1   : > { %v1368_v60 = vmax.f32 %v1312_v56, 0.0  ;;  %v1315_v61 = vadd.f32 %v2339_v59, %v2752_v54  ;;  %v1306_v62 = vpop.f32.mrb[19].mxu0 }
 0x2b2   : > { %v1366_v1 = vmax.f32 %v1304_v58, 0.0  ;;  %v1307_v3 = vadd.f32 %v2752_v54, %v1306_v62 }
 0x2b3   : > { %v1369_v5 = vmax.f32 %v1315_v61, 0.0  ;;  %v1400_v8 = vmul.f32 %v1384_v63, %v1368_v60 }
 0x2b4   : > { %v1367_v7 = vmax.f32 %v1307_v3, 0.0  ;;  %v1398_v10 = vmul.f32 %v1382_v4, %v1366_v1  ;;  %v1396_v3 = vld [vmem:[%s2758_s28 + $0x70] sm:$0xff] }
 0x2b5   : > { %v1401_v9 = vmul.f32 %v1385_v2, %v1369_v5  ;;  %v1397_v5 = vld [vmem:[%s2758_s28 + $0x78] sm:$0xff] }
 0x2b6   : > { %v1399_v11 = vmul.f32 %v1383_v6, %v1367_v7  ;;  %v2342_v12 = vpop.f32.mrb[20].mxu0  ;;  %v1394_v7 = vld [vmem:[%s2758_s28 + $0x60] sm:$0xff] }
 0x2b7   : > { %v1415_v13 = vpack.c.bf16 %v1401_v9, %v1400_v8  ;;  %v1328_v14 = vadd.f32 %v2342_v12, %v2752_v54  ;;  %v1319_v15 = vpop.f32.mrb[21].mxu0  ;;  %v1395_v9 = vld [vmem:[%s2758_s28 + $0x68] sm:$0xff]  ;;  %s2821_s28 = scalar_lea.vmem %s2950_s5, %s2566_s25 }
 0x2b8   : > { %v1414_v16 = vpack.c.bf16 %v1399_v11, %v1398_v10  ;;  %v1320_v17 = vadd.f32 %v2752_v54, %v1319_v15  ;;  %v2343_v18 = vpop.f32.mrb[22].mxu0 }
 0x2b9   : > { %v1372_v19 = vmax.f32 %v1328_v14, 0.0  ;;  %v1331_v20 = vadd.f32 %v2343_v18, %v2752_v54  ;;  %v1322_v21 = vpop.f32.mrb[23].mxu0  ;;  %v2438_v18 = vld [vmem:[%s2962_s17 + $0x8] sm:$0xff]  }
 0x2ba   : > { %v1370_v23 = vmax.f32 %v1320_v17, 0.0  ;;  %v1323_v25 = vadd.f32 %v2752_v54, %v1322_v21  ;;  %2354 = vmatprep.mubr.msk.bf16.mxu1 %vm1437_vm3, %v1414_v16  ;;  %v2437_v17 = vld [vmem:[%s2962_s17] sm:$0xff]  }
 0x2bb   : > { %v1373_v26 = vmax.f32 %v1331_v20, 0.0  ;;  %2355 = vmatmul.mubr.msk.bf16.vlgmr.msra.gmra.mrb[16].mxu1 %vm1437_vm3, %v1415_v13  ;;  %v1404_v30 = vmul.f32 %v1388_v22, %v1372_v19  ;;  %2392 = vmatprep.subr.bf16.mxu1 %v2437_v17  ;;  %v2439_v19 = vld [vmem:[%s2962_s17 + $0x10] sm:$0xff]   ;;  %v2815_v20 = vld [vmem:[%s2959_s14] ss:$0 sm:$0xff] }
 0x2bc   : > { %v1371_v29 = vmax.f32 %v1323_v25, 0.0  ;;  %v1402_v32 = vmul.f32 %v1386_v0, %v1370_v23  ;;  %2393 = vmatpush3.bf16.msra.mxu1 %v2437_v17 }
 0x2bd   : > { %v1405_v31 = vmul.f32 %v1389_v24, %v1373_v26  ;;  %2394 = vmatprep.subr.bf16.mxu1 %v2438_v18 }
 0x2be   : > { %v1403_v33 = vmul.f32 %v1387_v28, %v1371_v29  ;;  %v2346_v34 = vpop.f32.mrb[24].mxu0  ;;  %v1577_v29 = vld [vmem:[%s2821_s28 + $0x10] sm:$0xff] }
 0x2bf   : > { %v1417_v35 = vpack.c.bf16 %v1405_v31, %v1404_v30  ;;  %v1344_v36 = vadd.f32 %v2346_v34, %v2752_v54  ;;  %v1335_v37 = vpop.f32.mrb[25].mxu0  ;;  %v1578_v31 = vld [vmem:[%s2821_s28 + $0x18] sm:$0xff] }
 0x2c0   : > { %v1416_v38 = vpack.c.bf16 %v1403_v33, %v1402_v32  ;;  %v1336_v39 = vadd.f32 %v2752_v54, %v1335_v37  ;;  %v2347_v40 = vpop.f32.mrb[26].mxu0  ;;  %2395 = vmatpush3.bf16.msra.mxu1 %v2438_v18  ;;  %v1575_v33 = vld [vmem:[%s2821_s28] sm:$0xff] }
 0x2c1   : > { %v1376_v41 = vmax.f32 %v1344_v36, 0.0  ;;  %v1347_v42 = vadd.f32 %v2347_v40, %v2752_v54  ;;  %v1338_v43 = vpop.f32.mrb[27].mxu0  ;;  %2396 = vmatprep.subr.bf16.mxu1 %v2439_v19 }
 0x2c2   : > { %v1374_v45 = vmax.f32 %v1336_v39, 0.0  ;;  %v1339_v47 = vadd.f32 %v2752_v54, %v1338_v43  ;;  %2358 = vmatprep.mubr.msk.bf16.mxu1 %vm1437_vm3, %v1416_v38 }
 0x2c3   : > { %v1377_v49 = vmax.f32 %v1347_v42, 0.0  ;;  %2359 = vmatmul.mubr.msk.bf16.gmra.mrb[20].mxu1 %vm1437_vm3, %v1417_v35  ;;  %v1408_v52 = vmul.f32 %v1392_v44, %v1376_v41  ;;  %v1576_v35 = vld [vmem:[%s2821_s28 + $0x8] sm:$0xff] }
 0x2c4   : > { %v1375_v51 = vmax.f32 %v1339_v47, 0.0  ;;  %v1406_v53 = vmul.f32 %v1390_v48, %v1374_v45  ;;  %2397 = vmatpush3.bf16.msra.mxu1 %v2439_v19 }
 0x2c5   : > { %v1409_v27 = vmul.f32 %v1393_v46, %v1377_v49 }
 0x2c6   : > { %v1407_v55 = vmul.f32 %v1391_v50, %v1375_v51  ;;  %v2350_v56 = vpop.f32.mrb[28].mxu0  ;;  %v1581_v51 = vld [vmem:[%s2821_s28 + $0x30] sm:$0xff] }
 0x2c7   : > { %v1419_v57 = vpack.c.bf16 %v1409_v27, %v1408_v52  ;;  %v1360_v58 = vadd.f32 %v2350_v56, %v2752_v54  ;;  %v1351_v59 = vpop.f32.mrb[29].mxu0  ;;  %v1582_v27 = vld [vmem:[%s2821_s28 + $0x38] sm:$0xff] }
 0x2c8   : > { %v1418_v60 = vpack.c.bf16 %v1407_v55, %v1406_v53  ;;  %v1352_v61 = vadd.f32 %v2752_v54, %v1351_v59  ;;  %v2351_v62 = vpop.f32.mrb[30].mxu0  ;;  %v1579_v55 = vld [vmem:[%s2821_s28 + $0x20] sm:$0xff] }
 0x2c9   : > { %v1380_v63 = vmax.f32 %v1360_v58, 0.0  ;;  %v1363_v1 = vadd.f32 %v2351_v62, %v2752_v54  ;;  %v1354_v2 = vpop.f32.mrb[31].mxu0 }
 0x2ca   : > { %v1378_v4 = vmax.f32 %v1352_v61, 0.0  ;;  %v1355_v6 = vadd.f32 %v2752_v54, %v1354_v2  ;;  %2362 = vmatprep.mubr.msk.bf16.mxu1 %vm1437_vm3, %v1418_v60  ;;  %v2436_v54 = vld [vmem:[%s2960_s15 + $0x10] sm:$0xff]  }
 0x2cb   : > { %v1381_v8 = vmax.f32 %v1363_v1, 0.0  ;;  %2363 = vmatmul.mubr.msk.bf16.gmra.mrb[24].mxu1 %vm1437_vm3, %v1419_v57  ;;  %v1412_v11 = vmul.f32 %v1396_v3, %v1380_v63  ;;  %2374 = vmatprep.subr.bf16.mxu0 %v2436_v54  ;;  %v1580_v57 = vld [vmem:[%s2821_s28 + $0x28] sm:$0xff] }
 0x2cc   : > { %v1379_v10 = vmax.f32 %v1355_v6, 0.0  ;;  %v1410_v13 = vmul.f32 %v1394_v7, %v1378_v4  ;;  %2375 = vmatpush3.bf16.msra.mxu0 %v2436_v54 }
 0x2cd   : > { %v1413_v12 = vmul.f32 %v1397_v5, %v1381_v8 }
 0x2ce   : > { %v1411_v14 = vmul.f32 %v1395_v9, %v1379_v10  ;;  %v1585_v10 = vld [vmem:[%s2821_s28 + $0x50] sm:$0xff] }
 0x2cf   : > { %v1421_v15 = vpack.c.bf16 %v1413_v12, %v1412_v11  ;;  %v1586_v12 = vld [vmem:[%s2821_s28 + $0x58] sm:$0xff] }
 0x2d0   : > { %v1420_v16 = vpack.c.bf16 %v1411_v14, %v1410_v13  ;;  %v1583_v14 = vld [vmem:[%s2821_s28 + $0x40] sm:$0xff] }
 0x2d2   : > { %2366 = vmatprep.mubr.msk.bf16.mxu1 %vm1437_vm3, %v1420_v16  ;;  %v1584_v16 = vld [vmem:[%s2821_s28 + $0x48] sm:$0xff] }
 0x2d3   : > { %2367 = vmatmul.mubr.msk.bf16.gmra.mrb[28].mxu1 %vm1437_vm3, %v1421_v15 }
 0x38e   : > { %v2356_v21 = vpop.f32.mrb[16].mxu1 }
 0x38f   : > { %v1505_v22 = vadd.f32 %v2356_v21, %v2815_v20  ;;  %v1496_v23 = vpop.f32.mrb[17].mxu1 }
 0x390   : > { %v1497_v24 = vadd.f32 %v2815_v20, %v1496_v23  ;;  %v2357_v25 = vpop.f32.mrb[18].mxu1 }
 0x391   : > { %v1561_v0 = vmax.f32 %v1505_v22, 0.0  ;;  %v1508_v26 = vadd.f32 %v2357_v25, %v2815_v20  ;;  %v1499_v28 = vpop.f32.mrb[19].mxu1 }
 0x392   : > { %v1559_v30 = vmax.f32 %v1497_v24, 0.0  ;;  %v1500_v32 = vadd.f32 %v2815_v20, %v1499_v28 }
 0x393   : > { %v1562_v34 = vmax.f32 %v1508_v26, 0.0  ;;  %v1593_v37 = vmul.f32 %v1577_v29, %v1561_v0 }
 0x394   : > { %v1560_v36 = vmax.f32 %v1500_v32, 0.0  ;;  %v1591_v39 = vmul.f32 %v1575_v33, %v1559_v30  ;;  %v1589_v32 = vld [vmem:[%s2821_s28 + $0x70] sm:$0xff] }
 0x395   : > { %v1594_v38 = vmul.f32 %v1578_v31, %v1562_v34  ;;  %v1590_v34 = vld [vmem:[%s2821_s28 + $0x78] sm:$0xff] }
 0x396   : > { %v1592_v40 = vmul.f32 %v1576_v35, %v1560_v36  ;;  %v2360_v41 = vpop.f32.mrb[20].mxu1  ;;  %v1587_v36 = vld [vmem:[%s2821_s28 + $0x60] sm:$0xff] }
 0x397   : > { %v1608_v42 = vpack.c.bf16 %v1594_v38, %v1593_v37  ;;  %v1521_v43 = vadd.f32 %v2360_v41, %v2815_v20  ;;  %v1512_v44 = vpop.f32.mrb[21].mxu1  ;;  %v1588_v38 = vld [vmem:[%s2821_s28 + $0x68] sm:$0xff] }
 0x398   : > { %v1607_v45 = vpack.c.bf16 %v1592_v40, %v1591_v39  ;;  %v1513_v46 = vadd.f32 %v2815_v20, %v1512_v44  ;;  %v2361_v47 = vpop.f32.mrb[22].mxu1 }
 0x399   : > { %v1565_v48 = vmax.f32 %v1521_v43, 0.0  ;;  %v1524_v49 = vadd.f32 %v2361_v47, %v2815_v20  ;;  %v1515_v50 = vpop.f32.mrb[23].mxu1 }
 0x39a   : > { %v1563_v52 = vmax.f32 %v1513_v46, 0.0  ;;  %v1516_v53 = vadd.f32 %v2815_v20, %v1515_v50  ;;  %2376 = vmatprep.mubr.msk.bf16.mxu0 %vm1244_vm2, %v1607_v45  ;;  %v2869_v46 = vld [vmem:[%s2961_s16] ss:$0 sm:$0xff] }
 0x39b   : > { %v1566_v56 = vmax.f32 %v1524_v49, 0.0  ;;  %2377 = vmatmul.mubr.msk.bf16.vlgmr.msra.gmra.mrb[32].mxu0 %vm1244_vm2, %v1608_v42  ;;  %v1597_v59 = vmul.f32 %v1581_v51, %v1565_v48 }
 0x39c   : > { %v1564_v58 = vmax.f32 %v1516_v53, 0.0  ;;  %v1595_v61 = vmul.f32 %v1579_v55, %v1563_v52  ;;  %v1785_v55 = vld [vmem:[%s2875_s2 + $0x10] sm:$0xff] }
 0x39d   : > { %v1598_v60 = vmul.f32 %v1582_v27, %v1566_v56 }
 0x39e   : > { %v1596_v62 = vmul.f32 %v1580_v57, %v1564_v58  ;;  %v2364_v63 = vpop.f32.mrb[24].mxu1  ;;  %v1786_v57 = vld [vmem:[%s2875_s2 + $0x18] sm:$0xff] }
 0x39f   : > { %v1610_v1 = vpack.c.bf16 %v1598_v60, %v1597_v59  ;;  %v1537_v2 = vadd.f32 %v2364_v63, %v2815_v20  ;;  %v1528_v3 = vpop.f32.mrb[25].mxu1  ;;  %v1783_v59 = vld [vmem:[%s2875_s2] sm:$0xff] }
 0x3a0   : > { %v1609_v4 = vpack.c.bf16 %v1596_v62, %v1595_v61  ;;  %v1529_v5 = vadd.f32 %v2815_v20, %v1528_v3  ;;  %v2365_v6 = vpop.f32.mrb[26].mxu1  ;;  %v1784_v61 = vld [vmem:[%s2875_s2 + $0x8] sm:$0xff] }
 0x3a1   : > { %v1569_v7 = vmax.f32 %v1537_v2, 0.0  ;;  %v1540_v8 = vadd.f32 %v2365_v6, %v2815_v20  ;;  %v1531_v9 = vpop.f32.mrb[27].mxu1 }
 0x3a2   : > { %v1567_v11 = vmax.f32 %v1529_v5, 0.0  ;;  %v1532_v13 = vadd.f32 %v2815_v20, %v1531_v9  ;;  %2380 = vmatprep.mubr.msk.bf16.mxu0 %vm1244_vm2, %v1609_v4 }
 0x3a3   : > { %v1570_v15 = vmax.f32 %v1540_v8, 0.0  ;;  %2381 = vmatmul.mubr.msk.bf16.gmra.mrb[36].mxu0 %vm1244_vm2, %v1610_v1  ;;  %v1601_v17 = vmul.f32 %v1585_v10, %v1569_v7 }
 0x3a4   : > { %v1568_v54 = vmax.f32 %v1532_v13, 0.0  ;;  %v1599_v19 = vmul.f32 %v1583_v14, %v1567_v11  ;;  %v1789_v14 = vld [vmem:[%s2875_s2 + $0x30] sm:$0xff] }
 0x3a5   : > { %v1602_v18 = vmul.f32 %v1586_v12, %v1570_v15 }
 0x3a6   : > { %v1600_v21 = vmul.f32 %v1584_v16, %v1568_v54  ;;  %v2368_v22 = vpop.f32.mrb[28].mxu1  ;;  %v1790_v16 = vld [vmem:[%s2875_s2 + $0x38] sm:$0xff] }
 0x3a7   : > { %v1612_v23 = vpack.c.bf16 %v1602_v18, %v1601_v17  ;;  %v1553_v24 = vadd.f32 %v2368_v22, %v2815_v20  ;;  %v1544_v25 = vpop.f32.mrb[29].mxu1  ;;  %v1787_v17 = vld [vmem:[%s2875_s2 + $0x20] sm:$0xff] }
 0x3a8   : > { %v1611_v0 = vpack.c.bf16 %v1600_v21, %v1599_v19  ;;  %v1545_v26 = vadd.f32 %v2815_v20, %v1544_v25  ;;  %v2369_v28 = vpop.f32.mrb[30].mxu1  ;;  %v1788_v19 = vld [vmem:[%s2875_s2 + $0x28] sm:$0xff] }
 0x3a9   : > { %v1573_v29 = vmax.f32 %v1553_v24, 0.0  ;;  %v1556_v30 = vadd.f32 %v2369_v28, %v2815_v20  ;;  %v1547_v31 = vpop.f32.mrb[31].mxu1 }
 0x3aa   : > { %v1571_v33 = vmax.f32 %v1545_v26, 0.0  ;;  %v1548_v35 = vadd.f32 %v2815_v20, %v1547_v31  ;;  %2384 = vmatprep.mubr.msk.bf16.mxu0 %vm1244_vm2, %v1611_v0  ;;  %v2440_v20 = vld [vmem:[%s2962_s17 + $0x18] sm:$0xff]  }
 0x3ab   : > { %v1574_v37 = vmax.f32 %v1556_v30, 0.0  ;;  %2385 = vmatmul.mubr.msk.bf16.gmra.mrb[40].mxu0 %vm1244_vm2, %v1612_v23  ;;  %v1605_v40 = vmul.f32 %v1589_v32, %v1573_v29  ;;  %2398 = vmatprep.subr.bf16.mxu1 %v2440_v20 }
 0x3ac   : > { %v1572_v39 = vmax.f32 %v1548_v35, 0.0  ;;  %v1603_v42 = vmul.f32 %v1587_v36, %v1571_v33  ;;  %2399 = vmatpush3.bf16.msra.mxu1 %v2440_v20  ;;  %v1793_v36 = vld [vmem:[%s2875_s2 + $0x50] sm:$0xff] }
 0x3ad   : > { %v1606_v41 = vmul.f32 %v1590_v34, %v1574_v37 }
 0x3ae   : > { %v1604_v43 = vmul.f32 %v1588_v38, %v1572_v39  ;;  %v1794_v38 = vld [vmem:[%s2875_s2 + $0x58] sm:$0xff] }
 0x3af   : > { %v1614_v44 = vpack.c.bf16 %v1606_v41, %v1605_v40  ;;  %v1791_v40 = vld [vmem:[%s2875_s2 + $0x40] sm:$0xff] }
 0x3b0   : > { %v1613_v45 = vpack.c.bf16 %v1604_v43, %v1603_v42  ;;  %v1792_v42 = vld [vmem:[%s2875_s2 + $0x48] sm:$0xff] }
 0x3b2   : > { %2388 = vmatprep.mubr.msk.bf16.mxu0 %vm1244_vm2, %v1613_v45 }
 0x3b3   : > { %2389 = vmatmul.mubr.msk.bf16.gmra.mrb[44].mxu0 %vm1244_vm2, %v1614_v44 }
 0x46e   : > { %v2378_v47 = vpop.f32.mrb[32].mxu0 }
 0x46f   : > { %v1713_v48 = vadd.f32 %v2378_v47, %v2869_v46  ;;  %v1704_v49 = vpop.f32.mrb[33].mxu0 }
 0x470   : > { %v1705_v50 = vadd.f32 %v2869_v46, %v1704_v49  ;;  %v2379_v51 = vpop.f32.mrb[34].mxu0 }
 0x471   : > { %v1769_v52 = vmax.f32 %v1713_v48, 0.0  ;;  %v1716_v27 = vadd.f32 %v2379_v51, %v2869_v46  ;;  %v1707_v53 = vpop.f32.mrb[35].mxu0 }
 0x472   : > { %v1767_v56 = vmax.f32 %v1705_v50, 0.0  ;;  %v1708_v58 = vadd.f32 %v2869_v46, %v1707_v53 }
 0x473   : > { %v1770_v60 = vmax.f32 %v1716_v27, 0.0  ;;  %v1801_v63 = vmul.f32 %v1785_v55, %v1769_v52 }
 0x474   : > { %v1768_v62 = vmax.f32 %v1708_v58, 0.0  ;;  %v1799_v2 = vmul.f32 %v1783_v59, %v1767_v56  ;;  %v1797_v58 = vld [vmem:[%s2875_s2 + $0x70] sm:$0xff] }
 0x475   : > { %v1802_v1 = vmul.f32 %v1786_v57, %v1770_v60  ;;  %v1798_v60 = vld [vmem:[%s2875_s2 + $0x78] sm:$0xff] }
 0x476   : > { %v1800_v3 = vmul.f32 %v1784_v61, %v1768_v62  ;;  %v2382_v4 = vpop.f32.mrb[36].mxu0  ;;  %v1795_v62 = vld [vmem:[%s2875_s2 + $0x60] sm:$0xff] }
 0x477   : > { %v1816_v5 = vpack.c.bf16 %v1802_v1, %v1801_v63  ;;  %v1729_v6 = vadd.f32 %v2382_v4, %v2869_v46  ;;  %v1720_v7 = vpop.f32.mrb[37].mxu0  ;;  %v1796_v1 = vld [vmem:[%s2875_s2 + $0x68] sm:$0xff] }
 0x478   : > { %v1815_v8 = vpack.c.bf16 %v1800_v3, %v1799_v2  ;;  %v1721_v9 = vadd.f32 %v2869_v46, %v1720_v7  ;;  %v2383_v10 = vpop.f32.mrb[38].mxu0 }
 0x479   : > { %v1773_v11 = vmax.f32 %v1729_v6, 0.0  ;;  %v1732_v12 = vadd.f32 %v2383_v10, %v2869_v46  ;;  %v1723_v13 = vpop.f32.mrb[39].mxu0 }
 0x47a   : > { %v1771_v15 = vmax.f32 %v1721_v9, 0.0  ;;  %v1724_v54 = vadd.f32 %v2869_v46, %v1723_v13  ;;  %2400 = vmatprep.mubr.msk.bf16.mxu1 %vm1035_vm1, %v1815_v8 }
 0x47b   : > { %v1774_v18 = vmax.f32 %v1732_v12, 0.0  ;;  %2401 = vmatmul.mubr.msk.bf16.vlgmr.msra.gmra.mrb[32].mxu1 %vm1035_vm1, %v1816_v5  ;;  %v1805_v22 = vmul.f32 %v1789_v14, %v1773_v11 }
 0x47c   : > { %v1772_v21 = vmax.f32 %v1724_v54, 0.0  ;;  %v1803_v24 = vmul.f32 %v1787_v17, %v1771_v15 }
 0x47d   : > { %v1806_v23 = vmul.f32 %v1790_v16, %v1774_v18 }
 0x47e   : > { %v1804_v25 = vmul.f32 %v1788_v19, %v1772_v21  ;;  %v2386_v0 = vpop.f32.mrb[40].mxu0 }
 0x47f   : > { %v1818_v26 = vpack.c.bf16 %v1806_v23, %v1805_v22  ;;  %v1745_v28 = vadd.f32 %v2386_v0, %v2869_v46  ;;  %v1736_v29 = vpop.f32.mrb[41].mxu0 }
 0x480   : > { %v1817_v30 = vpack.c.bf16 %v1804_v25, %v1803_v24  ;;  %v1737_v31 = vadd.f32 %v2869_v46, %v1736_v29  ;;  %v2387_v32 = vpop.f32.mrb[42].mxu0 }
 0x481   : > { %v1777_v33 = vmax.f32 %v1745_v28, 0.0  ;;  %v1748_v34 = vadd.f32 %v2387_v32, %v2869_v46  ;;  %v1739_v35 = vpop.f32.mrb[43].mxu0 }
 0x482   : > { %v1775_v37 = vmax.f32 %v1737_v31, 0.0  ;;  %v1740_v39 = vadd.f32 %v2869_v46, %v1739_v35  ;;  %2404 = vmatprep.mubr.msk.bf16.mxu1 %vm1035_vm1, %v1817_v30 }
 0x483   : > { %v1778_v41 = vmax.f32 %v1748_v34, 0.0  ;;  %2405 = vmatmul.mubr.msk.bf16.gmra.mrb[36].mxu1 %vm1035_vm1, %v1818_v26  ;;  %v1809_v44 = vmul.f32 %v1793_v36, %v1777_v33 }
 0x484   : > { %v1776_v43 = vmax.f32 %v1740_v39, 0.0  ;;  %v1807_v20 = vmul.f32 %v1791_v40, %v1775_v37 }
 0x485   : > { %v1810_v45 = vmul.f32 %v1794_v38, %v1778_v41 }
 0x486   : > { %v1808_v47 = vmul.f32 %v1792_v42, %v1776_v43  ;;  %v2390_v48 = vpop.f32.mrb[44].mxu0 }
 0x487   : > { %v1820_v49 = vpack.c.bf16 %v1810_v45, %v1809_v44  ;;  %v1761_v50 = vadd.f32 %v2390_v48, %v2869_v46  ;;  %v1752_v51 = vpop.f32.mrb[45].mxu0 }
 0x488   : > { %v1819_v52 = vpack.c.bf16 %v1808_v47, %v1807_v20  ;;  %v1753_v27 = vadd.f32 %v2869_v46, %v1752_v51  ;;  %v2391_v53 = vpop.f32.mrb[46].mxu0 }
 0x489   : > { %v1781_v55 = vmax.f32 %v1761_v50, 0.0  ;;  %v1764_v56 = vadd.f32 %v2391_v53, %v2869_v46  ;;  %v1755_v57 = vpop.f32.mrb[47].mxu0 }
 0x48a   : > { %v1779_v59 = vmax.f32 %v1753_v27, 0.0  ;;  %v1756_v61 = vadd.f32 %v2869_v46, %v1755_v57  ;;  %2408 = vmatprep.mubr.msk.bf16.mxu1 %vm1035_vm1, %v1819_v52  ;;  %v2206_v46 = vld [vmem:[%s2963_s18] ss:$0 sm:$0xff] }
 0x48b   : > { %v1782_v63 = vmax.f32 %v1764_v56, 0.0  ;;  %2409 = vmatmul.mubr.msk.bf16.gmra.mrb[40].mxu1 %vm1035_vm1, %v1820_v49  ;;  %v1813_v3 = vmul.f32 %v1797_v58, %v1781_v55 }
 0x48c   : > { %v1780_v2 = vmax.f32 %v1756_v61, 0.0  ;;  %v1811_v5 = vmul.f32 %v1795_v62, %v1779_v59 }
 0x48d   : > { %v1814_v4 = vmul.f32 %v1798_v60, %v1782_v63 }
 0x48e   : > { %v1812_v6 = vmul.f32 %v1796_v1, %v1780_v2 }
 0x48f   : > { %v1822_v7 = vpack.c.bf16 %v1814_v4, %v1813_v3 }
 0x490   : > { %v1821_v8 = vpack.c.bf16 %v1812_v6, %v1811_v5 }
 0x492   : > { %2412 = vmatprep.mubr.msk.bf16.mxu1 %vm1035_vm1, %v1821_v8 }
 0x493   : > { %2413 = vmatmul.mubr.msk.bf16.gmra.mrb[44].mxu1 %vm1035_vm1, %v1822_v7 }
 0x54e   : > { %v2402_v9 = vpop.f32.mrb[32].mxu1 }
 0x54f   : > { %v1929_v10 = vadd.f32 %v2402_v9, %v2206_v46  ;;  %v1920_v11 = vpop.f32.mrb[33].mxu1 }
 0x550   : > { %v1921_v12 = vadd.f32 %v2206_v46, %v1920_v11  ;;  %v2403_v13 = vpop.f32.mrb[34].mxu1 }
 0x551   : > { %1985 = vst [vmem:[%s2924_s27 + $0x10] sm:$0xff] %v1929_v10  ;;  %v1932_v14 = vadd.f32 %v2403_v13, %v2206_v46  ;;  %v1923_v15 = vpop.f32.mrb[35].mxu1 }
 0x552   : > { %1983 = vst [vmem:[%s2924_s27] sm:$0xff] %v1921_v12  ;;  %v1924_v16 = vadd.f32 %v2206_v46, %v1923_v15 }
 0x553   : > { %1986 = vst [vmem:[%s2924_s27 + $0x18] sm:$0xff] %v1932_v14 }
 0x554   : > { %1984 = vst [vmem:[%s2924_s27 + $0x8] sm:$0xff] %v1924_v16 }
 0x556   : > { %v2406_v54 = vpop.f32.mrb[36].mxu1 }
 0x557   : > { %v1945_v17 = vadd.f32 %v2406_v54, %v2206_v46  ;;  %v1936_v18 = vpop.f32.mrb[37].mxu1 }
 0x558   : > { %v1937_v19 = vadd.f32 %v2206_v46, %v1936_v18  ;;  %v2407_v21 = vpop.f32.mrb[38].mxu1 }
 0x559   : > { %1989 = vst [vmem:[%s2924_s27 + $0x30] sm:$0xff] %v1945_v17  ;;  %v1948_v22 = vadd.f32 %v2407_v21, %v2206_v46  ;;  %v1939_v23 = vpop.f32.mrb[39].mxu1 }
 0x55a   : > { %1987 = vst [vmem:[%s2924_s27 + $0x20] sm:$0xff] %v1937_v19  ;;  %v1940_v24 = vadd.f32 %v2206_v46, %v1939_v23 }
 0x55b   : > { %1990 = vst [vmem:[%s2924_s27 + $0x38] sm:$0xff] %v1948_v22 }
 0x55c   : > { %1988 = vst [vmem:[%s2924_s27 + $0x28] sm:$0xff] %v1940_v24 }
 0x55e   : > { %v2410_v25 = vpop.f32.mrb[40].mxu1 }
 0x55f   : > { %v1961_v0 = vadd.f32 %v2410_v25, %v2206_v46  ;;  %v1952_v26 = vpop.f32.mrb[41].mxu1 }
 0x560   : > { %v1953_v28 = vadd.f32 %v2206_v46, %v1952_v26  ;;  %v2411_v29 = vpop.f32.mrb[42].mxu1 }
 0x561   : > { %1993 = vst [vmem:[%s2924_s27 + $0x50] sm:$0xff] %v1961_v0  ;;  %v1964_v30 = vadd.f32 %v2411_v29, %v2206_v46  ;;  %v1955_v31 = vpop.f32.mrb[43].mxu1 }
 0x562   : > { %1991 = vst [vmem:[%s2924_s27 + $0x40] sm:$0xff] %v1953_v28  ;;  %v1956_v32 = vadd.f32 %v2206_v46, %v1955_v31 }
 0x563   : > { %1994 = vst [vmem:[%s2924_s27 + $0x58] sm:$0xff] %v1964_v30 }
 0x564   : > { %1992 = vst [vmem:[%s2924_s27 + $0x48] sm:$0xff] %v1956_v32 }
 0x566   : > { %v2414_v33 = vpop.f32.mrb[44].mxu1 }
 0x567   : > { %v1977_v34 = vadd.f32 %v2414_v33, %v2206_v46  ;;  %v1968_v35 = vpop.f32.mrb[45].mxu1 }
 0x568   : > { %v1969_v36 = vadd.f32 %v2206_v46, %v1968_v35  ;;  %v2415_v37 = vpop.f32.mrb[46].mxu1 }
 0x569   : > { %1997 = vst [vmem:[%s2924_s27 + $0x70] sm:$0xff] %v1977_v34  ;;  %v1980_v38 = vadd.f32 %v2415_v37, %v2206_v46  ;;  %v1971_v39 = vpop.f32.mrb[47].mxu1 }
 0x56a   : > { %1995 = vst [vmem:[%s2924_s27 + $0x60] sm:$0xff] %v1969_v36  ;;  %v1972_v40 = vadd.f32 %v2206_v46, %v1971_v39 }
 0x56b   : > { %1998 = vst [vmem:[%s2924_s27 + $0x78] sm:$0xff] %v1980_v38 }
 0x56c   : > { %1996 = vst [vmem:[%s2924_s27 + $0x68] sm:$0xff] %v1972_v40 }
 0x56d PF: > { %s29_s0 = sadd.s32 1, %s2447_s0  }
 0x56e   : > { %p26_p4 = scmp.ge.s32.totalorder %s29_s0, 4  }
 0x570   :  { %28 = sbr.rel (!%p26_p4) target bundleno = 5 (0x5), region = 144 }

</bundles_post_ra>
